<compile_context>
chip_gen: v7x
topology: tpu7x:2x2x1
jax: 0.10.0
libtpu: 0.0.40
codegen_flags: <defaults>
</compile_context>

<pallas_src>
import jax
import jax.numpy as jnp
from jax.experimental import pallas as pl
from jax.experimental.pallas import tpu as pltpu


def _supcon_kernel(img_ref, eeg_ref, lab_col_ref, lab_row_ref,
                   row_dot_ref, row_den_ref, col_dot_ref, col_exp_ref):
    # Block shapes:
    #   img:      (TR, Dp) bf16   image rows for this row block (scale folded in)
    #   eeg:      (TC, Dp) bf16   eeg rows for this column block
    #   lab_col:  (TR, 1)  int32
    #   lab_row:  (1, TC)  int32
    # logits tile on the MXU, contracting the shared feature axis directly
    # (q @ k.T style dot_general, f32 accumulation).
    logits = jax.lax.dot_general(
        img_ref[...], eeg_ref[...],
        dimension_numbers=(((1,), (1,)), ((), ())),
        preferred_element_type=jnp.float32)                    # (TR, TC) f32

    eq = lab_col_ref[...] == lab_row_ref[...]                  # (TR, TC) bool
    masked = jnp.where(eq, logits, 0.0)                        # no int->f32 cast / extra mul
    expl = jnp.exp(logits)                                     # single EUP pass per tile

    # ---- image branch: accumulate row reductions across column blocks -----
    @pl.when(pl.program_id(1) == 0)
    def _():
        row_dot_ref[...] = jnp.zeros_like(row_dot_ref)
        row_den_ref[...] = jnp.zeros_like(row_den_ref)
    row_dot_ref[...] += jnp.sum(masked, axis=1, keepdims=True)  # (TR, 1)
    row_den_ref[...] += jnp.sum(expl,   axis=1, keepdims=True)  # (TR, 1)

    # ---- eeg branch: lane-dense column partials of the SAME tile ----------
    col_dot_ref[0, :, :] = jnp.sum(masked, axis=0, keepdims=True)   # (1, TC)
    col_exp_ref[0, :, :] = jnp.sum(expl,   axis=0, keepdims=True)   # (1, TC)


def _pick_tiles(b):
    """Return (Bp, TR, TC): padded batch, row tile, column tile."""
    if b <= 128:
        return b, b, b                       # full blocks, no padding needed
    bp = ((b + 255) // 256) * 256            # 256-aligned (MXU M/N on v6e/v7x)
    tc = 256
    tr = 256 if bp >= 512 else 128           # nb >= 2 -> both v7x TCs busy
    return bp, tr, tc


def supcon_loss(image_features, eeg_features, labels, logit_scale, temperature=0.07):
    """Pallas implementation of SupConLoss.forward.

    image_features: (B, D) float
    eeg_features:   (B, D) float
    labels:         (B,)   int
    logit_scale:    scalar (log-scale; exp() applied, CLIP-style)

    NOTE: `temperature` is accepted but unused -- the reference forward never
    reads it (signature parity only).
    """
    B, D = image_features.shape
    f32 = jnp.float32
    scale = jnp.exp(jnp.asarray(logit_scale, f32))     # traced scalar

    Bp, TR, TC = _pick_tiles(B)
    nb, nc = Bp // TR, Bp // TC
    pad_b = Bp - B
    NEG = f32(-1e9)    # exp(NEG) underflows to 0 -> padded rows/cols vanish

    # Fold exp(logit_scale) into the image features (MXU-side, removes a
    # (TR,TC) VALU multiply per tile) and append two bias feature columns:
    #   c1: img = 1,  eeg = -scale (real) / NEG (padded col)  -> constant shift
    #   c2: img = 0 (real) / NEG (padded row),  eeg = 1
    # The -scale shift cancels exactly in the log-domain loss (overflow guard).
    img = image_features.astype(f32) * scale
    eeg = eeg_features.astype(f32)
    ones_b = jnp.ones((B, 1), f32)
    zeros_b = jnp.zeros((B, 1), f32)
    img = jnp.concatenate([img, ones_b, zeros_b], axis=1)            # (B, D+2)
    eeg = jnp.concatenate([eeg, -scale * ones_b, ones_b], axis=1)    # (B, D+2)

    if pad_b:
        img_pad = jnp.zeros((pad_b, D + 2), f32).at[:, D].set(1.0).at[:, D + 1].set(NEG)
        eeg_pad = jnp.zeros((pad_b, D + 2), f32).at[:, D].set(NEG).at[:, D + 1].set(1.0)
        img = jnp.concatenate([img, img_pad], axis=0)
        eeg = jnp.concatenate([eeg, eeg_pad], axis=0)

    # Feature (contraction) dim zero-padded to a multiple of 128 (exact, MXU aligned).
    d_now = img.shape[1]
    Dp = ((d_now + 127) // 128) * 128
    if Dp != d_now:
        img = jnp.pad(img, ((0, 0), (0, Dp - d_now)))
        eeg = jnp.pad(eeg, ((0, 0), (0, Dp - d_now)))

    # bf16 MXU operands (f32 accumulation inside the kernel).
    img = img.astype(jnp.bfloat16)
    eeg = eeg.astype(jnp.bfloat16)

    lab = labels.astype(jnp.int32)
    if pad_b:
        sentinel = jnp.max(lab) + 1          # never equals a real label
        lab_p = jnp.concatenate([lab, jnp.full((pad_b,), 0, jnp.int32) + sentinel])
    else:
        lab_p = lab
    lab_col = lab_p.reshape(Bp, 1)
    lab_row = lab_p.reshape(1, Bp)

    # VMEM budget: double-buffered bf16 feature tiles + (TR,TC) f32 temps.
    bf = 2
    vmem_need = 2 * (TR * Dp + TC * Dp) * bf
    vmem_need += 4 * TR * TC * 4
    vmem_need += 4 * (TR * 128 + 2 * TC) * 4
    try:
        cap = int(getattr(pltpu.get_tpu_info(), "vmem_capacity_bytes", 64 << 20))
    except Exception:  # pragma: no cover - conservative fallback
        cap = 64 << 20
    vmem_limit = int(min(max(3 * vmem_need, 16 << 20), (cap * 3) // 4))

    cost = pl.CostEstimate(
        flops=2 * Bp * Bp * Dp,
        transcendentals=Bp * Bp,
        bytes_accessed=nb * nc * (TR + TC) * Dp * bf + (2 * Bp + 2 * nb * Bp) * 4,
    )

    row_dot, row_den, col_dot, col_exp = pl.pallas_call(
        _supcon_kernel,
        grid=(nb, nc),
        out_shape=(
            jax.ShapeDtypeStruct((Bp, 1), f32),        # row sums of mask*logits
            jax.ShapeDtypeStruct((Bp, 1), f32),        # row sums of exp(logits)
            jax.ShapeDtypeStruct((nb, 1, Bp), f32),    # per-row-block col sums of mask*logits
            jax.ShapeDtypeStruct((nb, 1, Bp), f32),    # per-row-block col sums of exp(logits)
        ),
        in_specs=[
            pl.BlockSpec((TR, Dp), lambda i, j: (i, 0)),   # image rows
            pl.BlockSpec((TC, Dp), lambda i, j: (j, 0)),   # eeg rows (column block)
            pl.BlockSpec((TR, 1), lambda i, j: (i, 0)),    # labels (row block)
            pl.BlockSpec((1, TC), lambda i, j: (0, j)),    # labels (column block)
        ],
        out_specs=(
            pl.BlockSpec((TR, 1), lambda i, j: (i, 0)),        # resident across j
            pl.BlockSpec((TR, 1), lambda i, j: (i, 0)),        # resident across j
            pl.BlockSpec((1, 1, TC), lambda i, j: (i, 0, j)),  # lane-dense partials
            pl.BlockSpec((1, 1, TC), lambda i, j: (i, 0, j)),
        ),
        compiler_params=pltpu.CompilerParams(
            dimension_semantics=("parallel", "arbitrary"),
            vmem_limit_bytes=vmem_limit,
        ),
        cost_estimate=cost,
    )(img, eeg, lab_col, lab_row)

    # ---- O(B) epilogue (exact integer positive counts, exact division) ----
    counts = jnp.sum((lab[:, None] == lab[None, :]).astype(f32), axis=1)   # (B,)
    row_terms = row_dot[:B, 0] / counts - jnp.log(row_den[:B, 0])
    col_d = jnp.sum(col_dot, axis=(0, 1))[:B]
    col_e = jnp.sum(col_exp, axis=(0, 1))[:B]
    col_terms = col_d / counts - jnp.log(col_e)        # mask symmetry: same counts

    # loss = (loss_im + loss_eeg) / 2, each = -mean(per-row term)
    return -(jnp.sum(row_terms) + jnp.sum(col_terms)) / (2.0 * float(B))


def _reference(image_features, eeg_features, labels, logit_scale):
    # Pure-JAX mirror of the PyTorch module, for correctness checking.
    labels = labels.reshape(-1, 1)
    mask = (labels == labels.T).astype(jnp.float32)
    ls = jnp.exp(logit_scale)
    logits_im = ls * image_features.astype(jnp.float32) @ eeg_features.astype(jnp.float32).T
    logits_eeg = logits_im.T

    def contrastive(logits):
        mask_nosim = 1.0 - mask
        exp_logits = jnp.exp(logits)
        probs = exp_logits * mask / jnp.sum(exp_logits, axis=1, keepdims=True)
        probs = probs + mask_nosim
        log_prob = jnp.sum(jnp.log(probs), axis=1) / jnp.sum(mask, axis=1)
        return -jnp.mean(log_prob)

    return (contrastive(logits_im) + contrastive(logits_eeg)) / 2.0


if __name__ == "__main__":
    key = jax.random.PRNGKey(0)
    k1, k2, k3 = jax.random.split(key, 3)

    B, D = 8, 32
    image_features = jax.random.normal(k1, (B, D), dtype=jnp.float32)
    eeg_features = jax.random.normal(k2, (B, D), dtype=jnp.float32)
    # L2-normalize (typical contrastive usage; keeps exp() well-behaved)
    image_features = image_features / jnp.linalg.norm(image_features, axis=1, keepdims=True)
    eeg_features = eeg_features / jnp.linalg.norm(eeg_features, axis=1, keepdims=True)
    labels = jax.random.randint(k3, (B,), 0, 4, dtype=jnp.int32)
    logit_scale = jnp.float32(jnp.log(1.0 / 0.07))  # CLIP-style, init ln(1/T)

    loss = supcon_loss(image_features, eeg_features, labels, logit_scale)
    loss = jax.block_until_ready(loss)

    ref = _reference(image_features, eeg_features, labels, logit_scale)
    # 5e-2 tolerance: bf16 MXU operands (deliberate, review-requested) bound the
    # logit error to ~0.5%, which propagates roughly additively into the loss.
    assert jnp.allclose(loss, ref, rtol=5e-2, atol=5e-2), (loss, ref)

    print("KERNEL_OK")
</pallas_src>

<mosaic_0001>
module attributes {stable_mosaic.version = 11 : i64} {
  func.func @_supcon_kernel(%arg0: i32, %arg1: i32, %arg2: memref<8x128xbf16, #tpu.memory_space<vmem>>, %arg3: memref<8x128xbf16, #tpu.memory_space<vmem>>, %arg4: memref<8x1xi32, #tpu.memory_space<vmem>>, %arg5: memref<1x8xi32, #tpu.memory_space<vmem>>, %arg6: memref<8x1xf32, #tpu.memory_space<vmem>>, %arg7: memref<8x1xf32, #tpu.memory_space<vmem>>, %arg8: memref<1x1x8xf32, #tpu.memory_space<vmem>>, %arg9: memref<1x1x8xf32, #tpu.memory_space<vmem>>) attributes {dimension_semantics = [#tpu.dimension_semantics<parallel>, #tpu.dimension_semantics<arbitrary>], iteration_bounds = array<i64: 1, 1>, scalar_prefetch = 0 : i64, scratch_operands = 0 : i64, tpu.core_type = #tpu.core_type<tc>, window_params = [{transform_indices = @transform_0, window_bounds = array<i64: 8, 128>}, {transform_indices = @transform_1, window_bounds = array<i64: 8, 128>}, {transform_indices = @transform_2, window_bounds = array<i64: 8, 1>}, {transform_indices = @transform_3, window_bounds = array<i64: 1, 8>}, {transform_indices = @transform_4, window_bounds = array<i64: 8, 1>}, {transform_indices = @transform_5, window_bounds = array<i64: 8, 1>}, {transform_indices = @transform_6, window_bounds = array<i64: 1, 1, 8>}, {transform_indices = @transform_7, window_bounds = array<i64: 1, 1, 8>}]} {
    %c0 = arith.constant 0 : index
    %c0_0 = arith.constant 0 : index
    %0 = vector.load %arg2[%c0, %c0_0] : memref<8x128xbf16, #tpu.memory_space<vmem>>, vector<8x128xbf16>
    %c0_1 = arith.constant 0 : index
    %c0_2 = arith.constant 0 : index
    %1 = vector.load %arg3[%c0_1, %c0_2] : memref<8x128xbf16, #tpu.memory_space<vmem>>, vector<8x128xbf16>
    %cst = arith.constant dense<0.000000e+00> : vector<8x8xf32>
    %2 = tpu.matmul %0, %1, %cst {dimension_numbers = #tpu.dot_dimension_numbers<[1], [1], [0], [0], [0, 0, 1, 0], [], []>} : vector<8x128xbf16>, vector<8x128xbf16>, vector<8x8xf32> -> vector<8x8xf32>
    %c0_3 = arith.constant 0 : index
    %c0_4 = arith.constant 0 : index
    %3 = vector.load %arg4[%c0_3, %c0_4] : memref<8x1xi32, #tpu.memory_space<vmem>>, vector<8x1xi32>
    %c0_5 = arith.constant 0 : index
    %c0_6 = arith.constant 0 : index
    %4 = vector.load %arg5[%c0_5, %c0_6] : memref<1x8xi32, #tpu.memory_space<vmem>>, vector<1x8xi32>
    %5 = vector.broadcast %3 : vector<8x1xi32> to vector<8x8xi32>
    %6 = vector.broadcast %4 : vector<1x8xi32> to vector<8x8xi32>
    %7 = arith.cmpi eq, %5, %6 : vector<8x8xi32>
    %cst_7 = arith.constant 0.000000e+00 : f32
    %8 = vector.broadcast %cst_7 : f32 to vector<8x8xf32>
    %9 = arith.select %7, %2, %8 : vector<8x8xi1>, vector<8x8xf32>
    %10 = math.exp %2 : vector<8x8xf32>
    %c0_i32 = arith.constant 0 : i32
    %11 = arith.cmpi eq, %arg1, %c0_i32 : i32
    %12 = arith.extui %11 : i1 to i32
    %c0_i32_8 = arith.constant 0 : i32
    %13 = arith.cmpi ne, %12, %c0_i32_8 : i32
    scf.if %13 {
      %cst_27 = arith.constant 0.000000e+00 : f32
      %34 = vector.broadcast %cst_27 : f32 to vector<8x1xf32>
      %c0_28 = arith.constant 0 : index
      %c0_29 = arith.constant 0 : index
      %35 = vector.load %arg6[%c0_28, %c0_29] : memref<8x1xf32, #tpu.memory_space<vmem>>, vector<8x1xf32>
      tpu.vector_store %arg6[%c0_28, %c0_29], %34 {strides = array<i32>} : memref<8x1xf32, #tpu.memory_space<vmem>>, vector<8x1xf32>,
      %cst_30 = arith.constant 0.000000e+00 : f32
      %36 = vector.broadcast %cst_30 : f32 to vector<8x1xf32>
      %c0_31 = arith.constant 0 : index
      %c0_32 = arith.constant 0 : index
      %37 = vector.load %arg7[%c0_31, %c0_32] : memref<8x1xf32, #tpu.memory_space<vmem>>, vector<8x1xf32>
      tpu.vector_store %arg7[%c0_31, %c0_32], %36 {strides = array<i32>} : memref<8x1xf32, #tpu.memory_space<vmem>>, vector<8x1xf32>,
    } else {
    }
    %c0_9 = arith.constant 0 : index
    %c0_10 = arith.constant 0 : index
    %14 = vector.load %arg6[%c0_9, %c0_10] : memref<8x1xf32, #tpu.memory_space<vmem>>, vector<8x1xf32>
    %cst_11 = arith.constant dense<0.000000e+00> : vector<8xf32>
    %15 = vector.multi_reduction <add>, %9, %cst_11 [1] : vector<8x8xf32> to vector<8xf32>
    %16 = vector.shape_cast %15 : vector<8xf32> to vector<8x1xf32>
    %17 = arith.addf %14, %16 : vector<8x1xf32>
    %c0_12 = arith.constant 0 : index
    %c0_13 = arith.constant 0 : index
    %18 = vector.load %arg6[%c0_12, %c0_13] : memref<8x1xf32, #tpu.memory_space<vmem>>, vector<8x1xf32>
    tpu.vector_store %arg6[%c0_12, %c0_13], %17 {strides = array<i32>} : memref<8x1xf32, #tpu.memory_space<vmem>>, vector<8x1xf32>,
    %c0_14 = arith.constant 0 : index
    %c0_15 = arith.constant 0 : index
    %19 = vector.load %arg7[%c0_14, %c0_15] : memref<8x1xf32, #tpu.memory_space<vmem>>, vector<8x1xf32>
    %cst_16 = arith.constant dense<0.000000e+00> : vector<8xf32>
    %20 = vector.multi_reduction <add>, %10, %cst_16 [1] : vector<8x8xf32> to vector<8xf32>
    %21 = vector.shape_cast %20 : vector<8xf32> to vector<8x1xf32>
    %22 = arith.addf %19, %21 : vector<8x1xf32>
    %c0_17 = arith.constant 0 : index
    %c0_18 = arith.constant 0 : index
    %23 = vector.load %arg7[%c0_17, %c0_18] : memref<8x1xf32, #tpu.memory_space<vmem>>, vector<8x1xf32>
    tpu.vector_store %arg7[%c0_17, %c0_18], %22 {strides = array<i32>} : memref<8x1xf32, #tpu.memory_space<vmem>>, vector<8x1xf32>,
    %cst_19 = arith.constant dense<0.000000e+00> : vector<8xf32>
    %24 = vector.multi_reduction <add>, %9, %cst_19 [0] : vector<8x8xf32> to vector<8xf32>
    %25 = vector.shape_cast %24 : vector<8xf32> to vector<1x8xf32>
    %c0_20 = arith.constant 0 : index
    %c0_21 = arith.constant 0 : index
    %c0_22 = arith.constant 0 : index
    %26 = vector.load %arg8[%c0_20, %c0_21, %c0_22] : memref<1x1x8xf32, #tpu.memory_space<vmem>>, vector<1x1x8xf32>
    %27 = vector.shape_cast %26 : vector<1x1x8xf32> to vector<1x8xf32>
    %28 = vector.shape_cast %25 : vector<1x8xf32> to vector<1x1x8xf32>
    tpu.vector_store %arg8[%c0_20, %c0_21, %c0_22], %28 {strides = array<i32>} : memref<1x1x8xf32, #tpu.memory_space<vmem>>, vector<1x1x8xf32>,
    %cst_23 = arith.constant dense<0.000000e+00> : vector<8xf32>
    %29 = vector.multi_reduction <add>, %10, %cst_23 [0] : vector<8x8xf32> to vector<8xf32>
    %30 = vector.shape_cast %29 : vector<8xf32> to vector<1x8xf32>
    %c0_24 = arith.constant 0 : index
    %c0_25 = arith.constant 0 : index
    %c0_26 = arith.constant 0 : index
    %31 = vector.load %arg9[%c0_24, %c0_25, %c0_26] : memref<1x1x8xf32, #tpu.memory_space<vmem>>, vector<1x1x8xf32>
    %32 = vector.shape_cast %31 : vector<1x1x8xf32> to vector<1x8xf32>
    %33 = vector.shape_cast %30 : vector<1x8xf32> to vector<1x1x8xf32>
    tpu.vector_store %arg9[%c0_24, %c0_25, %c0_26], %33 {strides = array<i32>} : memref<1x1x8xf32, #tpu.memory_space<vmem>>, vector<1x1x8xf32>,
    return
  }
  func.func @transform_0(%arg0: i32, %arg1: i32) -> (i32, i32) {
    %c0_i32 = arith.constant 0 : i32
    %c0_i32_0 = arith.constant 0 : i32
    return %arg0, %c0_i32 : i32, i32
  }
  func.func @transform_1(%arg0: i32, %arg1: i32) -> (i32, i32) {
    %c0_i32 = arith.constant 0 : i32
    %c0_i32_0 = arith.constant 0 : i32
    return %arg1, %c0_i32 : i32, i32
  }
  func.func @transform_2(%arg0: i32, %arg1: i32) -> (i32, i32) {
    %c0_i32 = arith.constant 0 : i32
    %c0_i32_0 = arith.constant 0 : i32
    return %arg0, %c0_i32 : i32, i32
  }
  func.func @transform_3(%arg0: i32, %arg1: i32) -> (i32, i32) {
    %c0_i32 = arith.constant 0 : i32
    %c0_i32_0 = arith.constant 0 : i32
    return %c0_i32, %arg1 : i32, i32
  }
  func.func @transform_4(%arg0: i32, %arg1: i32) -> (i32, i32) {
    %c0_i32 = arith.constant 0 : i32
    %c0_i32_0 = arith.constant 0 : i32
    return %arg0, %c0_i32 : i32, i32
  }
  func.func @transform_5(%arg0: i32, %arg1: i32) -> (i32, i32) {
    %c0_i32 = arith.constant 0 : i32
    %c0_i32_0 = arith.constant 0 : i32
    return %arg0, %c0_i32 : i32, i32
  }
  func.func @transform_6(%arg0: i32, %arg1: i32) -> (i32, i32, i32) {
    %c0_i32 = arith.constant 0 : i32
    %c0_i32_0 = arith.constant 0 : i32
    return %arg0, %c0_i32, %arg1 : i32, i32, i32
  }
  func.func @transform_7(%arg0: i32, %arg1: i32) -> (i32, i32, i32) {
    %c0_i32 = arith.constant 0 : i32
    %c0_i32_0 = arith.constant 0 : i32
    return %arg0, %c0_i32, %arg1 : i32, i32, i32
  }
}

</mosaic_0001>

<bundles_post_ra>
// kernel: tpu_custom_call.1
= control target key start
LH: loop header
LB: loop body
LE: loop exit
PB: predicated region body
PF: predicated region fallthrough
CT: control target
= control target key end

     0   :  { %13 = vsyncpa [#allocation3], 0  ;;  %vm83_vm0 = vcmask 7168   ;;  %v216_v1 = vmov 0.0   ;;  %vm217_vm1 = vmmov 0   ;;  %v218_v3 = vmov 0   ;;  %s321_s0 = inlined_call_operand.vmem [shape: bf16[8,128], index: 0, kind: input, shape index: {}]   ;;  %s322_s1 = inlined_call_operand.vmem [shape: bf16[8,128], index: 1, kind: input, shape index: {}]   ;;  %s323_s2 = inlined_call_operand.vmem [shape: s32[8,1], index: 2, kind: input, shape index: {}]   ;;  %s324_s3 = inlined_call_operand.vmem [shape: s32[1,8], index: 3, kind: input, shape index: {}]   ;;  %s325_s4 = inlined_call_operand.vmem [shape: f32[8,1], index: 4, kind: output, shape index: {0}]   ;;  %s326_s5 = inlined_call_operand.vmem [shape: f32[8,1], index: 5, kind: output, shape index: {1}]   ;;  %s327_s6 = inlined_call_operand.hbm [shape: f32[1,1,8], index: 6, kind: output, shape index: {2}]   ;;  %s328_s7 = inlined_call_operand.hbm [shape: f32[1,1,8], index: 7, kind: output, shape index: {3}]  }
   0x1   :  { %v25_v0 = vld [vmem:[%s322_s1] sm:$0xf]  ;;  %154 = vmatprep.subr.bf16.mxu0 %v216_v1  ;;  %84 = vst.msk [vmem:[%s325_s4] sm:$0xff] %vm83_vm0, %v216_v1  ;;  %85 = vst.msk [vmem:[%s326_s5] sm:$0xff] %vm83_vm0, %v216_v1  ;;  %156 = vmatprep.mubr.msk.bf16.mxu0 %vm217_vm1, %v216_v1 }
   0x2   :  { %v66_v2 = vld [vmem:[%s323_s2] sm:$0xff]  ;;  %155 = vmatpush3.bf16.xpose.msra.mxu0 %v25_v0  ;;  %165 = vset.pattern.permute.xlu0 %v218_v3 }
   0x3   :  { %14 = vsyncpa [#allocation5], 0  ;;  %69 = vperm.xlu0 %165, %v66_v2   ;;  %v24_v4 = vld [vmem:[%s321_s0] sm:$0xf]  ;;  %vm87_vm3 = vcmask 64512   ;;  %vm106_vm4 = vcmask 57344  }
   0x4   :  { %v151_v5 = vld [vmem:[%s324_s3] ss:$0 sm:$0xff]  ;;  %s219_s0 = smov [#allocation2]   ;;  %s220_s3 = smov [#allocation4]  }
   0x5   :  { %s125_s2 = sshll.u32 %s219_s0, 4  ;;  %s135_s12 = sshll.u32 %s220_s3, 4  ;;  %s126_s2 = int_to_ptr.vmem [resolvable:$true] %s125_s2  ;;  %s136_s12 = int_to_ptr.vmem [resolvable:$true] %s135_s12 }
   0x6   :  { %s168_s13 = scalar_lea.vmem %s126_s2, 16  ;;  %s172_s14 = scalar_lea.vmem %s126_s2, 32 }
   0x7   :  { %p169_p0 = scmp.ne.s32.totalorder %s126_s2, %s168_s13  ;;  %p173_p1 = scmp.lt.s32.totalorder %s126_s2, %s126_s2 }
   0x8   :  { %p174_p2 = scmp.lt.s32.totalorder %s172_s14, %s168_s13 }
   0x9   :  { %157 = vmatmul.mubr.bf16.vlgmr.msra.gmra.mrb[0].mxu0 %v24_v4 }
   0xa   :  { %p175_p3 = por %p174_p2, %p173_p1 }
   0xc   :  { %p176_p4 = pnand %p175_p3, %p169_p0 }
  0x82   :  { %v70_v6 = vpop.permute.xlu0 %69 }
  0x83   :  { %vm75_vm2 = vcmp.eq.s32.totalorder %v70_v6, %v151_v5 }
  0xdc   :  { %v60_v7 = vpop.f32.mrb[0].mxu0 }
  0xdd   :  { %v76_v8 = vsel %vm75_vm2, %v60_v7, 0.0  ;;  %v77_v9 = vmul.f32 1.442695, %v60_v7  ;;  %v158_v10 = vpop.f32.mrb[1].mxu0 }
  0xde   :  { %v63_v11 = vpop.f32.mrb[2].mxu0  ;;  %v88_v12 = vsel %vm87_vm3, %v76_v8, 0.0 }
  0xdf   :  { %166 = vpow2.f32 %v77_v9  ;;  %89 = vadd.xlane.f32.xlu0 %v88_v12  ;;  %v100_v13 = vrot.slane %v88_v12, 4  ;;  %v159_v14 = vpop.f32.mrb[3].mxu0 }
  0xe1   :  { %v101_v15 = vadd.f32 %v100_v13, %v88_v12 }
  0xe3   :  { %v102_v16 = vrot.slane %v101_v15, 2 }
  0xe5   :  { %v103_v17 = vadd.f32 %v102_v16, %v101_v15 }
  0xe7   :  { %v104_v18 = vrot.slane %v103_v17, 1 }
  0xe9   :  { %v167_v19 = vpop.eup %166  ;;  %v105_v20 = vadd.f32 %v104_v18, %v103_v17 }
  0xea   :  { %v95_v21 = vsel %vm87_vm3, %v167_v19, 0.0 }
  0xeb   :  { %96 = vadd.xlane.f32.xlu1 %v95_v21  ;;  %v108_v22 = vrot.slane %v95_v21, 4  ;;  %107 = vst.msk [vmem:[#allocation2] sm:$0x1] %vm106_vm4, %v105_v20 }
  0xed   :  { %v109_v23 = vadd.f32 %v108_v22, %v95_v21 }
  0xef   :  { %v110_v24 = vrot.slane %v109_v23, 2 }
  0xf1   :  { %v111_v25 = vadd.f32 %v110_v24, %v109_v23 }
  0xf3   :  { %v112_v26 = vrot.slane %v111_v25, 1 }
  0xf5   :  { %v113_v27 = vadd.f32 %v112_v26, %v111_v25 }
  0xf7   :  { %114 = vst.msk [vmem:[#allocation4] sm:$0x1] %vm106_vm4, %v113_v27 }
  0xf8   :  { %179 = shalt.err (!%p176_p4)
}
  0xf9   :  { %s180_s17 = scalar_lea.hbm %s327_s6, 16 }
  0xfa   :  { %p181_p5 = scmp.ne.s32.totalorder %s327_s6, %s180_s17  ;;  %p184_p6 = scmp.lt.u32.totalorder %s180_s17, %s327_s6 }
  0xfc   :  { %p186_p7 = pnand %p184_p6, %p181_p5 }
  0xfe   :  { %189 = shalt.err (!%p186_p7)
}
  0xff   :  { %128 = dma.vmem_to_hbm [thread:$0]  %s126_s2, 16, %s327_s6, [#allocation3]  }
 0x100   :  { %s190_s24 = scalar_lea.vmem %s136_s12, 16  ;;  %s194_s25 = scalar_lea.vmem %s136_s12, 32 }
 0x101   :  { %p191_p8 = scmp.ne.s32.totalorder %s136_s12, %s190_s24  ;;  %p195_p9 = scmp.lt.s32.totalorder %s136_s12, %s136_s12 }
 0x102   :  { %p196_p10 = scmp.lt.s32.totalorder %s194_s25, %s190_s24 }
 0x104   :  { %p197_p11 = por %p196_p10, %p195_p9 }
 0x106   :  { %p198_p12 = pnand %p197_p11, %p191_p8 }
 0x108   :  { %201 = shalt.err (!%p198_p12)
}
 0x109   :  { %s202_s28 = scalar_lea.hbm %s328_s7, 16 }
 0x10a   :  { %p203_p13 = scmp.ne.s32.totalorder %s328_s7, %s202_s28  ;;  %p206_p0 = scmp.lt.u32.totalorder %s202_s28, %s328_s7 }
 0x10c   :  { %p208_p1 = pnand %p206_p0, %p203_p13 }
 0x10e   :  { %211 = shalt.err (!%p208_p1)
}
 0x10f   :  { %138 = dma.vmem_to_hbm [thread:$0]  %s136_s12, 16, %s328_s7, [#allocation5]   ;;  %v86_v28 = vld [vmem:[%s325_s4] sm:$0xff] }
 0x110   :  { %v94_v31 = vld [vmem:[%s326_s5] sm:$0xff] }
 0x16c   :  { %v90_v29 = vpop.xlane.xlu0 %89 }
 0x16d   :  { %v91_v30 = vadd.f32 %v90_v29, %v86_v28 }
 0x16f   :  { %93 = vst.msk [vmem:[%s325_s4] sm:$0xff] %vm83_vm0, %v91_v30 }
 0x178   :  { %v97_v32 = vpop.xlane.xlu1 %96 }
 0x179   :  { %v98_v33 = vadd.f32 %v97_v32, %v94_v31 }
 0x17b   :  { %99 = vst.msk [vmem:[%s326_s5] sm:$0xff] %vm83_vm0, %v98_v33 }
 0x17c   :  { %212 = dma.done.wait [#allocation3], 16  }
 0x17d   :  { %213 = vsyncadd [#allocation3], 4294967280 }
 0x17e   :  { %214 = dma.done.wait [#allocation5], 16  }
 0x17f   :  { %215 = vsyncadd [#allocation5], 4294967280 }
 0x180   :  { %149 = vsyncpa [#allocation3], 1 }
 0x181   :  { %150 = vsyncpa [#allocation5], 1 }

</bundles_post_ra>
